<compile_context>
chip_gen: v7x
topology: tpu7x:2x2x1
jax: 0.10.0
libtpu: 0.0.40
codegen_flags: <defaults>
</compile_context>

<pallas_src>
import functools
import math

import jax
import jax.numpy as jnp
from jax.experimental import pallas as pl
from jax.experimental.pallas import tpu as pltpu

_EPS = 1e-12  # torch F.normalize default eps


def _rmsnorm_kernel(x_ref, gamma_ref, o_ref, *, scale):
    # x_ref: (tile_rows, dim), gamma_ref: (1, dim), o_ref: (tile_rows, dim)
    x = x_ref[...].astype(jnp.float32)
    sq_sum = jnp.sum(x * x, axis=-1, keepdims=True)          # (tile, 1) XLU reduce
    # 1 / max(sqrt(s), eps) == min(rsqrt(s), 1/eps); rsqrt is one EUP op per
    # row, removing a full-tile divide.  Fold sqrt(dim) into the per-row factor.
    inv = jnp.minimum(jax.lax.rsqrt(sq_sum), 1.0 / _EPS) * scale   # (tile, 1)
    g = gamma_ref[...].astype(jnp.float32)                   # (1, dim)
    y = (x * inv) * g                                         # 2 full-tile VPU muls
    o_ref[...] = y.astype(o_ref.dtype)


def _sublane_pack(dtype):
    # Sub-32-bit dtypes pack along sublanes: f32 -> 8, bf16 -> 16, int8 -> 32.
    return max(8, 32 // jnp.dtype(dtype).itemsize)


def _round_up(x, m):
    return ((x + m - 1) // m) * m


def rmsnorm(x, gamma, *, vmem_budget_bytes=32 * 1024 * 1024):
    """x: (..., dim) array, gamma: (dim,) parameter."""
    orig_shape = x.shape
    dim = orig_shape[-1]
    rows = int(math.prod(orig_shape[:-1])) if len(orig_shape) > 1 else 1
    x2d = x.reshape(rows, dim)
    gamma2d = gamma.reshape(1, dim)
    scale = float(dim) ** 0.5

    itemsize = jnp.dtype(x.dtype).itemsize
    pack = _sublane_pack(x.dtype)

    # Largest row tile that fits the VMEM budget:
    #   double-buffered input + output blocks ~= 4 * tile_rows * dim * itemsize.
    tile_rows = max(pack, vmem_budget_bytes // (4 * dim * itemsize))
    tile_rows = min(tile_rows, 1024)
    tile_rows = min(tile_rows, _round_up(rows, pack))
    tile_rows = max(pack, (tile_rows // pack) * pack)

    # Keep at least 2 grid steps when possible so the parallel axis can be
    # sharded across TensorCores (v7x has 2 TCs/chip).
    if rows // tile_rows < 2 and rows >= 2 * pack:
        tile_rows = max(pack, ((rows // 2) // pack) * pack)

    # Non-divisible fallback: pad rows up to a tile multiple (padded zero rows
    # produce zeros, no NaNs) and slice afterwards.  Typical (batch*seq) row
    # counts are already multiples of the sublane pack, so this is rarely hit.
    rows_p = _round_up(rows, tile_rows)
    if rows_p != rows:
        x2d = jnp.pad(x2d, ((0, rows_p - rows), (0, 0)))

    grid = (rows_p // tile_rows,)

    # TODO(synk): for dim < 128 (lane-sparse output) a lane-folding layout
    # would avoid masked partial stores; typical model dims (>=512) don't need it.
    out = pl.pallas_call(
        functools.partial(_rmsnorm_kernel, scale=scale),
        out_shape=jax.ShapeDtypeStruct((rows_p, dim), x.dtype),
        grid_spec=pltpu.PrefetchScalarGridSpec(
            num_scalar_prefetch=0,
            grid=grid,
            in_specs=[
                pl.BlockSpec((tile_rows, dim), lambda i: (i, 0)),
                pl.BlockSpec((1, dim), lambda i: (0, 0)),   # gamma stays resident
            ],
            out_specs=pl.BlockSpec((tile_rows, dim), lambda i: (i, 0)),
        ),
        compiler_params=pltpu.CompilerParams(
            dimension_semantics=("parallel",),
            vmem_limit_bytes=48 * 1024 * 1024,  # headroom, <= v7x's 64 MiB physical
        ),
    )(x2d, gamma2d)

    if rows_p != rows:
        out = out[:rows]
    return out.reshape(orig_shape)


if __name__ == "__main__":
    key = jax.random.PRNGKey(0)
    batch, seq, dim = 2, 8, 32

    x = jax.random.normal(key, (batch, seq, dim), dtype=jnp.float32)
    # nn.Parameter(torch.ones(dim)) — deterministic init matching the module.
    gamma = jnp.ones((dim,), dtype=jnp.float32)

    y = rmsnorm(x, gamma)
    y = jax.block_until_ready(y)

    # Pure-JAX reference check (matches torch F.normalize semantics).
    norm = jnp.maximum(
        jnp.sqrt(jnp.sum(x.astype(jnp.float32) ** 2, axis=-1, keepdims=True)),
        1e-12,
    )
    y_ref = x / norm * (dim ** 0.5) * gamma
    assert jnp.allclose(y, y_ref, atol=1e-5, rtol=1e-5), "mismatch vs reference"

    print("KERNEL_OK")
</pallas_src>

<mosaic_0001>
module attributes {stable_mosaic.version = 11 : i64} {
  func.func @_rmsnorm_kernel(%arg0: i32, %arg1: memref<8x32xf32, #tpu.memory_space<vmem>>, %arg2: memref<1x32xf32, #tpu.memory_space<vmem>>, %arg3: memref<8x32xf32, #tpu.memory_space<vmem>>) attributes {dimension_semantics = [#tpu.dimension_semantics<parallel>], iteration_bounds = array<i64: 2>, scalar_prefetch = 0 : i64, scratch_operands = 0 : i64, tpu.core_type = #tpu.core_type<tc>, window_params = [{transform_indices = @transform_0, window_bounds = array<i64: 8, 32>}, {pipeline_mode = #tpu.pipeline_mode<synchronous>, transform_indices = @transform_1, window_bounds = array<i64: 1, 32>}, {transform_indices = @transform_2, window_bounds = array<i64: 8, 32>}]} {
    %c0 = arith.constant 0 : index
    %c0_0 = arith.constant 0 : index
    %0 = vector.load %arg1[%c0, %c0_0] : memref<8x32xf32, #tpu.memory_space<vmem>>, vector<8x32xf32>
    %1 = arith.mulf %0, %0 : vector<8x32xf32>
    %cst = arith.constant dense<0.000000e+00> : vector<8xf32>
    %2 = vector.multi_reduction <add>, %1, %cst [1] : vector<8x32xf32> to vector<8xf32>
    %3 = vector.shape_cast %2 : vector<8xf32> to vector<8x1xf32>
    %4 = math.rsqrt %3 : vector<8x1xf32>
    %cst_1 = arith.constant 9.99999995E+11 : f32
    %5 = vector.broadcast %cst_1 : f32 to vector<8x1xf32>
    %6 = arith.minimumf %4, %5 : vector<8x1xf32>
    %cst_2 = arith.constant 5.65685415 : f32
    %7 = vector.broadcast %cst_2 : f32 to vector<8x1xf32>
    %8 = arith.mulf %6, %7 : vector<8x1xf32>
    %c0_3 = arith.constant 0 : index
    %c0_4 = arith.constant 0 : index
    %9 = vector.load %arg2[%c0_3, %c0_4] : memref<1x32xf32, #tpu.memory_space<vmem>>, vector<1x32xf32>
    %10 = vector.broadcast %8 : vector<8x1xf32> to vector<8x32xf32>
    %11 = arith.mulf %0, %10 : vector<8x32xf32>
    %12 = vector.broadcast %9 : vector<1x32xf32> to vector<8x32xf32>
    %13 = arith.mulf %11, %12 : vector<8x32xf32>
    %c0_5 = arith.constant 0 : index
    %c0_6 = arith.constant 0 : index
    %14 = vector.load %arg3[%c0_5, %c0_6] : memref<8x32xf32, #tpu.memory_space<vmem>>, vector<8x32xf32>
    tpu.vector_store %arg3[%c0_5, %c0_6], %13 {strides = array<i32>} : memref<8x32xf32, #tpu.memory_space<vmem>>, vector<8x32xf32>,
    return
  }
  func.func @transform_0(%arg0: i32) -> (i32, i32) {
    %c0_i32 = arith.constant 0 : i32
    %c0_i32_0 = arith.constant 0 : i32
    return %arg0, %c0_i32 : i32, i32
  }
  func.func @transform_1(%arg0: i32) -> (i32, i32) {
    %c0_i32 = arith.constant 0 : i32
    %c0_i32_0 = arith.constant 0 : i32
    %c0_i32_1 = arith.constant 0 : i32
    return %c0_i32, %c0_i32_0 : i32, i32
  }
  func.func @transform_2(%arg0: i32) -> (i32, i32) {
    %c0_i32 = arith.constant 0 : i32
    %c0_i32_0 = arith.constant 0 : i32
    return %arg0, %c0_i32 : i32, i32
  }
}

</mosaic_0001>

<bundles_post_ra>
// kernel: tpu_custom_call.1
= control target key start
LH: loop header
LB: loop body
LE: loop exit
PB: predicated region body
PF: predicated region fallthrough
CT: control target
= control target key end

     0   :  { %7 = vsyncpa [#allocation3], 0  ;;  %s604_s0 = inlined_call_operand.hbm [shape: f32[16,32], index: 0, kind: input, shape index: {}]   ;;  %s605_s1 = inlined_call_operand.vmem [shape: f32[1,32], index: 1, kind: input, shape index: {}]   ;;  %s606_s2 = inlined_call_operand.hbm [shape: f32[16,32], index: 2, kind: output, shape index: {}]  }
   0x1   :  { %9 = vsyncpa [#allocation3 + $0x1], 0 }
   0x2   :  { %10 = vsyncpa [#allocation4], 0 }
   0x3   :  { %12 = vsyncpa [#allocation4 + $0x1], 0  ;;  %s438_s9 = smov 0   ;;  %s440_s10 = smov 0  }
   0x4   :  { %s442_s11 = smov 0   ;;  %s444_s12 = smov 0  }
   0x5 LB: > { %s459_s13 = sadd.s32 4294967295, %s419_s12   ;;  %s262_s14 = sadd.s32 4294967294, %s419_s12   ;;  %s419_s12 = sphi %s444_s12, %s621_s12   ;;  %s415_s11 = sphi %s442_s11, %s620_s11   ;;  %s411_s10 = sphi %s440_s10, %s619_s10   ;;  %s407_s9 = sphi %s438_s9, %s618_s9  }
   0x6   : > { %s463_s15 = sadd.s32 1, %s419_s12   ;;  %s25_s16 = sadd.s32 1, %s415_s11 }
   0x7   : > { %s22_s17 = ssub.s32 %s419_s12, %s463_s15  ;;  %p32_p0 = scmp.ne.s32.totalorder %s415_s11, %s411_s10 }
   0x8   : > { %p23_p1 = scmp.eq.s32.totalorder %s22_s17, 0  ;;  %p33_p2 = scmp.eq.s32.totalorder %s419_s12, 0 }
   0x9   : > { %p38_p3 = scmp.ne.s32.totalorder %s411_s10, %s407_s9  ;;  %p39_p4 = scmp.eq.s32.totalorder %s459_s13, 0 }
   0xa   : > { %s475_s18 = scalar_select %p23_p1, %s415_s11, %s25_s16  }
   0xb   : > { %p477_p5 = por %p33_p2, %p32_p0  ;;  %p481_p6 = por %p39_p4, %p38_p3 }
   0xc   : > { %p83_p7 = scmp.eq.s32.totalorder %s459_s13, 1  ;;  %p89_p8 = scmp.eq.s32.totalorder %s262_s14, 1 }
   0xd   : > { %p287_p10 = scmp.lt.s32.totalorder %s419_s12, 2  ;;  %s112_s23 = sand.u32 1, %s415_s11  }
   0xe   : > { %p488_p11 = por %p83_p7, %p32_p0  ;;  %p492_p12 = por %p89_p8, %p38_p3 }
   0xf   : > { %s266_s24 = sshll.u32 %s419_s12, 7  ;;  %s265_s25 = sshll.u32 %s112_s23, 3 }
  0x10   : > { %s610_s21 = scalar_select %p488_p11, 1, 0 }
  0x11   : > { %s611_s22 = scalar_select %p492_p12, 1, 0 }
  0x12   : > { %s501_s28 = scalar_lea.hbm %s604_s0, %s266_s24  ;;  %s116_s29 = scalar_lea.vmem [#allocation2], %s265_s25 }
  0x13   : > { %s123_s30 = sshll.u32 %s116_s29, 4  ;;  %p505_p13 = pnand %p287_p10, %p477_p5  ;;  %s509_s30 = int_to_ptr.vmem [resolvable:$true] %s123_s30 }
  0x14   : > { %s113_s4 = scalar_lea.sflag [#allocation3], %s112_s23  ;;  %s323_s5 = scalar_lea.hbm %s501_s28, 128 }
  0x15   : > { %p324_p2 = scmp.ne.s32.totalorder %s501_s28, %s323_s5  ;;  %p325_p3 = pneg %p505_p13 }
  0x16   : > { %s328_s8 = scalar_lea.hbm %s604_s0, 256  ;;  %p329_p5 = scmp.lt.u32.totalorder %s501_s28, %s604_s0 }
  0x17   : > { %p326_p4 = pnand %p325_p3, %p324_p2  ;;  %p330_p8 = scmp.lt.u32.totalorder %s328_s8, %s323_s5 }
  0x18   : > { %p332_p9 = scmp.lt.u32.totalorder %s323_s5, %s501_s28 }
  0x19   : > { %p327_p7 = pneg %p326_p4  ;;  %p331_p10 = por %p330_p8, %p329_p5 }
  0x1b   : > { %p333_p0 = por %p332_p9, %p331_p10 }
  0x1d   : > { %p334_p1 = pnand %p333_p0, %p327_p7 }
  0x1f   : > { %337 = shalt.err (!%p334_p1)
}
  0x20   : > { %s338_s17 = scalar_lea.vmem %s509_s30, 128  ;;  %s421_s19 = smov [#allocation2]  }
  0x21   : > { %p339_p2 = scmp.ne.s32.totalorder %s509_s30, %s338_s17  ;;  %s343_s23 = sshll.u32 %s421_s19, 4  ;;  %s344_s23 = int_to_ptr.vmem [resolvable:$false] %s343_s23 }
  0x22   : > { %s345_s24 = scalar_lea.vmem %s344_s23, 256  ;;  %p346_p11 = scmp.lt.s32.totalorder %s509_s30, %s344_s23 }
  0x23   : > { %p341_p4 = pnand %p339_p2, %p325_p3  ;;  %p347_p5 = scmp.lt.s32.totalorder %s345_s24, %s338_s17 }
  0x25   : > { %p342_p12 = pneg %p341_p4  ;;  %p348_p8 = por %p347_p5, %p346_p11 }
  0x27   : > { %p349_p9 = pnand %p348_p8, %p342_p12 }
  0x29   : > { %352 = shalt.err (!%p349_p9)
}
  0x2a   : > { %282 = dma.hbm_to_vmem [thread:$0]  (!%p505_p13), %s501_s28, 128, %s509_s30, %s113_s4  }
  0x2b   : > { %p613_p0 = scmp.lt.s32.totalorder %s419_s12, 3  ;;  %p614_p1 = scmp.ge.s32.totalorder %s419_s12, 1 }
  0x2d   : > { %p129_p3 = pnand %p614_p1, %p613_p0 }
  0x2e   : > { %s543_s25 = sand.u32 (!%p129_p3), 1, %s411_s10  }
  0x2f   : > { %132 = sbr.rel (%p129_p3) target bundleno = 234 (0xea), region = 28  ;;  %s268_s26 = sshll.u32 (!%p129_p3), %s543_s25, 3 }
  0x30   : > { %s135_s27 = scalar_lea.sflag (!%p129_p3), [#allocation3], %s543_s25  ;;  %s138_s29 = scalar_lea.vmem (!%p129_p3), [#allocation2], %s268_s26 }
  0x36   : > { %398 = dma.done.wait (%p481_p6), %s135_s27, 128  }
  0x37   : > { %400 = vsyncadd (%p481_p6), %s135_s27, 4294967168  ;;  %v159_v0 = vld [vmem:[%s138_s29] sm:$0xff]  ;;  %vm161_vm0 = vcmask 261120   ;;  %s272_s20 = sshll.u32 %s459_s13, 7  ;;  %s158_s3 = scalar_lea.vmem [#allocation5], %s268_s26 }
  0x38   : > { %v160_v1 = vmul.f32 %v159_v0, %v159_v0  ;;  %v270_v7 = vld [vmem:[%s605_s1] ss:$0 sm:$0xff]  ;;  %s192_s4 = sshll.u32 %s158_s3, 4  ;;  %s559_s7 = scalar_lea.hbm %s606_s2, %s272_s20  ;;  %s561_s4 = int_to_ptr.vmem [resolvable:$true] %s192_s4 }
  0x39   : > { %s179_s8 = scalar_lea.sflag [#allocation4], %s543_s25  ;;  %s353_s14 = scalar_lea.vmem %s561_s4, 128 }
  0x3a   : > { %v162_v2 = vsel %vm161_vm0, %v160_v1, 0.0  ;;  %p354_p6 = scmp.ne.s32.totalorder %s561_s4, %s353_s14  ;;  %p615_p11 = scmp.ne.s32.totalorder %s610_s21, 0 }
  0x3b   : > { %163 = vadd.xlane.f32.xlu0 %v162_v2  ;;  %s422_s13 = smov [#allocation5]  }
  0x3c   : > { %p355_p12 = pnand %p354_p6, %p615_p11  ;;  %s357_s16 = sshll.u32 %s422_s13, 4  ;;  %s358_s16 = int_to_ptr.vmem [resolvable:$false] %s357_s16 }
  0x3d   : > { %s359_s17 = scalar_lea.vmem %s358_s16, 256  ;;  %p360_p7 = scmp.lt.s32.totalorder %s561_s4, %s358_s16 }
  0x3e   : > { %p356_p13 = pneg %p355_p12  ;;  %p361_p10 = scmp.lt.s32.totalorder %s359_s17, %s353_s14 }
  0x40   : > { %p362_p2 = por %p361_p10, %p360_p7 }
  0x42   : > { %p363_p4 = pnand %p362_p2, %p356_p13 }
  0xc8   : > { %v164_v3 = vpop.xlane.xlu0 %163 }
  0xc9   : > { %321 = vrsqrt.f32 %v164_v3 }
  0xd3   : > { %v322_v4 = vpop.eup %321 }
  0xd4   : > { %v166_v5 = vmin.f32 %v322_v4, 1e+12 }
  0xd6   : > { %v167_v6 = vmul.f32 5.656854, %v166_v5 }
  0xd8   : > { %v169_v8 = vmul.f32 %v167_v6, %v159_v0 }
  0xda   : > { %v176_v9 = vmul.f32 %v270_v7, %v169_v8 }
  0xdc   : > { %177 = vst.msk [vmem:[%s158_s3] sm:$0xff] %vm161_vm0, %v176_v9 }
  0xdd   : > { %366 = shalt.err (!%p363_p4)
}
  0xde   : > { %s367_s19 = scalar_lea.hbm %s559_s7, 128  ;;  %s371_s25 = scalar_lea.hbm %s606_s2, 256 }
  0xdf   : > { %p368_p5 = scmp.ne.s32.totalorder %s559_s7, %s367_s19  ;;  %p372_p0 = scmp.lt.u32.totalorder %s559_s7, %s606_s2 }
  0xe0   : > { %p373_p1 = scmp.lt.u32.totalorder %s371_s25, %s367_s19  ;;  %p375_p6 = scmp.lt.u32.totalorder %s367_s19, %s559_s7 }
  0xe1   : > { %p369_p8 = pnand %p368_p5, %p615_p11 }
  0xe2   : > { %p374_p3 = por %p373_p1, %p372_p0 }
  0xe3   : > { %p370_p9 = pneg %p369_p8 }
  0xe4   : > { %p376_p12 = por %p375_p6, %p374_p3 }
  0xe6   : > { %p377_p13 = pnand %p376_p12, %p370_p9 }
  0xe8   : > { %380 = shalt.err (!%p377_p13)
}
  0xe9   : > { %277 = dma.vmem_to_hbm [thread:$0]  (%p615_p11), %s561_s4, 128, %s559_s7, %s179_s8  }
  0xea PF: > { %s204_s29 = sand.u32 1, %s407_s9   ;;  %p616_p7 = scmp.ne.s32.totalorder %s611_s22, 0 }
  0xeb   : > { %p617_p10 = scmp.ge.s32.totalorder %s419_s12, 2  ;;  %s205_s28 = scalar_lea.sflag [#allocation4], %s204_s29 }
  0xed   : > { %p284_p2 = pnand %p617_p10, %p616_p7 }
  0xef   : > { %402 = dma.done.wait (!%p284_p2), %s205_s28, 128  }
  0xf0   : > { %404 = vsyncadd (!%p284_p2), %s205_s28, 4294967168  ;;  %p15_p4 = scmp.ge.s32.totalorder %s463_s15, 4   ;;  %s618_s9 = smov %s411_s10 }
  0xf1   : > { %s619_s10 = smov %s415_s11  ;;  %s620_s11 = smov %s475_s18 }
  0xf2   : > { %s621_s12 = smov %s463_s15  ;;  %17 = sbr.rel (!%p15_p4) target bundleno = 5 (0x5), region = 73 }
  0xf9   :  { %210 = vsyncpa [#allocation3], 1 }
  0xfa   :  { %212 = vsyncpa [#allocation3 + $0x1], 1 }
  0xfb   :  { %213 = vsyncpa [#allocation4], 1 }
  0xfc   :  { %215 = vsyncpa [#allocation4 + $0x1], 1 }

</bundles_post_ra>
